<compile_context>
chip_gen: v5e
topology: v5e:2x2
jax: 0.10.0
libtpu: 0.0.40
codegen_flags: <defaults>
</compile_context>

<pallas_src>
import functools

import jax
import jax.numpy as jnp
from jax.experimental import pallas as pl
from jax.experimental.pallas import tpu as pltpu


_LANE = 128
_SH_C0 = 0.28209479177387814          # l=0 SH constant (folded into the bias)
_SH_Z2_OFFSET = -0.31539156525251999  # additive part of the z^2 basis term

# SH normalization constants, index 0..15 (degree-4 SphericalHarmonics, tcnn
# ordering).  Index 6 is the multiplicative z^2 coefficient; its additive
# constant is _SH_Z2_OFFSET (folded into the bias).
_SH_CONST = jnp.array([
    0.28209479177387814,    # 0: 1
    -0.48860251190291987,   # 1: y
    0.48860251190291987,    # 2: z
    -0.48860251190291987,   # 3: x
    1.0925484305920792,     # 4: xy
    -1.0925484305920792,    # 5: yz
    0.94617469575755997,    # 6: z^2
    -1.0925484305920792,    # 7: xz
    0.54627421529603959,    # 8: x^2 - y^2
    0.59004358992664352,    # 9: y (y^2 - 3x^2)
    2.8906114426405538,     # 10: xyz
    0.45704579946446572,    # 11: y (1 - 5z^2)
    0.3731763325901154,     # 12: z (5z^2 - 3)
    0.45704579946446572,    # 13: x (1 - 5z^2)
    1.4453057213202769,     # 14: z (x^2 - y^2)
    0.59004358992664352,    # 15: x (3y^2 - x^2)
], dtype=jnp.float32)


# ----------------------------------------------------------------------------
# Pallas kernel: entire folded CNet data path for one lane-tile of rows.
# ----------------------------------------------------------------------------
def _cnet_kernel(xin_ref, w_ref, coef_ref, b_ref, c_ref):
    xin = xin_ref[...]                                   # (Din+3, T) bf16

    # Folded linear path: layer_sl(layer_d(s_feat)) + l=0 + l=1 SH terms.
    # Single bf16 MXU matmul, f32 accumulation.
    logits = jnp.dot(w_ref[...], xin,
                     preferred_element_type=jnp.float32)  # (3, T)
    logits = logits + b_ref[...]                          # (3, 1) lane-bcast

    # Directions for the l>=2 SH terms.  The module maps v -> (v+1)*0.5 and
    # tcnn maps back with 2u-1, so the effective direction is v itself.
    d = xin[0:3, :].astype(jnp.float32)                   # (3, T) f32
    x, y, z = d[0:1, :], d[1:2, :], d[2:3, :]

    # Shared sub-expressions; squares computed as a single (3, T) block op.
    sq = d * d                                            # (x2, y2, z2)
    x2, y2, z2 = sq[0:1, :], sq[1:2, :], sq[2:3, :]
    xy, yz, xz = x * y, y * z, x * z
    xmy = x2 - y2
    z2_5 = 5.0 * z2
    t5 = 1.0 - z2_5

    # Raw l=2 / l=3 basis terms (SH constants pre-folded into `coef`), in the
    # SH-index order 4..15.  Each term is a lane-dense (1, T) row.
    terms = (
        xy,                                               # 4
        yz,                                               # 5
        z2,                                               # 6 (const -> bias)
        xz,                                               # 7
        xmy,                                              # 8
        y * (y2 - 3.0 * x2),                              # 9
        xy * z,                                           # 10
        y * t5,                                           # 11
        z * (z2_5 - 3.0),                                 # 12
        x * t5,                                           # 13
        z * xmy,                                          # 14
        x * (3.0 * y2 - x2),                              # 15
    )

    # Accumulate the SH contribution of every term for all 3 outputs at once:
    # (3,1) coefficient column * (1,T) term -> (3,T).  This replaces both the
    # 15-row concatenate and the tiny f32 (3,15) matmul of the old kernel.
    coef = coef_ref[...]                                  # (3, 12) f32
    for j, t in enumerate(terms):
        logits = logits + coef[:, j:j + 1] * t

    c_ref[...] = jax.nn.sigmoid(logits).astype(c_ref.dtype)


# ----------------------------------------------------------------------------
# Parameter setup: weight_norm resolution + layer/SH folding.
# ----------------------------------------------------------------------------
def _weight_norm(v, g):
    # PyTorch nn.utils.weight_norm with default dim=0: per-output-row norm.
    return g * v / jnp.linalg.norm(v, axis=1, keepdims=True)


def init_cnet_params(key, input_dim, hidden_dim, n_sh=16):
    k = jax.random.split(key, 6)
    vd = jax.random.normal(k[0], (hidden_dim, input_dim), jnp.float32) * 0.1
    gd = jax.random.uniform(k[1], (hidden_dim, 1), jnp.float32, 0.5, 1.5)
    bd = jax.random.normal(k[2], (hidden_dim,), jnp.float32) * 0.01
    vs = jax.random.normal(k[3], (3, hidden_dim + n_sh), jnp.float32) * 0.1
    gs = jax.random.uniform(k[4], (3, 1), jnp.float32, 0.5, 1.5)
    bs = jax.random.normal(k[5], (3,), jnp.float32) * 0.01

    wd = _weight_norm(vd, gd)            # (H, Din)   effective layer_d weight
    ws = _weight_norm(vs, gs)            # (3, H+16)  effective layer_sl weight

    ws1 = ws[:, :hidden_dim]             # (3, H)   applies to d_feat
    wsh = ws[:, hidden_dim:]             # (3, 16)  applies to the SH encoding

    # Fold layer_d into layer_sl (no nonlinearity in between).
    w_s = ws1 @ wd                       # (3, Din)

    # Fold the l=1 SH terms into matmul columns for the [x, y, z] input rows.
    w_dir = jnp.stack([
        _SH_CONST[3] * wsh[:, 3],        # x column
        _SH_CONST[1] * wsh[:, 1],        # y column
        _SH_CONST[2] * wsh[:, 2],        # z column
    ], axis=1)                           # (3, 3)

    # Kernel input rows are [x, y, z, s_feat...]; match the column order.
    w_aug = jnp.concatenate([w_dir, w_s], axis=1)         # (3, Din+3)

    # Fold layer_d bias, l=0 term and the z^2 additive constant into the bias.
    b_eff = (bs + ws1 @ bd
             + _SH_C0 * wsh[:, 0]
             + _SH_Z2_OFFSET * wsh[:, 6])                  # (3,)

    # l>=2 SH coefficients with the SH constants pre-multiplied (indices 4..15).
    coef = wsh[:, 4:] * _SH_CONST[4:][None, :]             # (3, 12)

    return dict(
        # full-precision reference parameters (PyTorch-equivalent)
        wd=wd, bd=bd, ws=ws, bs=bs,
        # kernel-ready parameters
        w_aug=w_aug.astype(jnp.bfloat16),                  # (3, Din+3) bf16
        coef=coef.astype(jnp.float32),                     # (3, 12)    f32
        b_eff=b_eff.reshape(3, 1).astype(jnp.float32),     # (3, 1)     f32
    )


# ----------------------------------------------------------------------------
# Forward wrapper: one fused layout pass + tiled, pipelined pallas_call.
# ----------------------------------------------------------------------------
@functools.partial(jax.jit, static_argnames=("tile_rows",))
def cnet_forward(params, l_emb, x_emb, s_feat, n, v, tile_rows=32768):
    """Mirrors CNet.forward(l_emb, x_emb, s_feat, n, v).  l_emb/x_emb/n unused."""
    del l_emb, x_emb, n
    Nv, Nr, Din = s_feat.shape
    feat = Din + 3
    N = Nv * Nr

    # Single fused wrapper pass: cast to bf16, transpose rows->lanes, and
    # concatenate [v ; s_feat] into one (Din+3, N) bf16 block.  No jnp.pad:
    # a partial tail tile is handled by Pallas block masking.
    v2t = v.reshape(N, 3).astype(jnp.bfloat16).T            # (3, N)
    s2t = s_feat.reshape(N, Din).astype(jnp.bfloat16).T     # (Din, N)
    xin = jnp.concatenate([v2t, s2t], axis=0)               # (Din+3, N)

    # Row (lane) tile: multiple of 128.  32K rows keeps the working set
    # ~10-12 MiB (fits the explicit 32 MiB vmem limit on all generations).
    # v5e: 16384 is also fine; v7x: can go to 65536 if the limit is raised
    # (64 MiB physical per TensorCore).
    n128 = pl.cdiv(N, _LANE) * _LANE
    tile = min(tile_rows, n128)
    tile = pl.cdiv(tile, _LANE) * _LANE
    grid = (pl.cdiv(N, tile),)

    # Advisory cost hint (HBM-light, small-matmul + VPU SH epilogue).
    flops = N * (2 * 3 * feat + 150)
    bytes_accessed = N * (feat * 2 + 3 * 2) + 3 * (feat + 12 + 1) * 4
    cost = pl.CostEstimate(flops=flops, transcendentals=3 * N,
                           bytes_accessed=bytes_accessed)

    c_t = pl.pallas_call(
        _cnet_kernel,
        out_shape=jax.ShapeDtypeStruct((3, N), jnp.bfloat16),
        grid_spec=pltpu.PrefetchScalarGridSpec(
            num_scalar_prefetch=0,
            grid=grid,
            in_specs=[
                pl.BlockSpec((feat, tile), lambda i: (0, i)),   # xin tile
                pl.BlockSpec((3, feat), lambda i: (0, 0)),      # W_aug (resident)
                pl.BlockSpec((3, 12), lambda i: (0, 0)),        # SH coef (resident)
                pl.BlockSpec((3, 1), lambda i: (0, 0)),         # bias (resident)
            ],
            out_specs=pl.BlockSpec((3, tile), lambda i: (0, i)),
        ),
        compiler_params=pltpu.CompilerParams(
            # "parallel" lets the row axis shard across both TCs on v7x; on
            # v5e/v6e (single TC) it is equivalent to "arbitrary".
            dimension_semantics=("parallel",),
            vmem_limit_bytes=32 * 1024 * 1024,
        ),
        cost_estimate=cost,
    )(xin, params["w_aug"], params["coef"], params["b_eff"])

    # Final small untranspose back to the module's (Nv, Nr, 3) f32 layout.
    c = c_t.astype(jnp.float32).T.reshape(Nv, Nr, 3)
    return c, jnp.zeros_like(c), jnp.zeros_like(c)


# ----------------------------------------------------------------------------
# Pure-JAX full-precision reference (PyTorch-equivalent math) for validation.
# ----------------------------------------------------------------------------
def cnet_reference(params, s_feat, v):
    d_feat = jnp.einsum("vrd,hd->vrh", s_feat, params["wd"]) + params["bd"]
    d = ((v + 1.0) * 0.5) * 2.0 - 1.0
    x, y, z = d[..., 0:1], d[..., 1:2], d[..., 2:3]
    xy, xz, yz = x * y, x * z, y * z
    x2, y2, z2 = x * x, y * y, z * z
    sh = jnp.concatenate([
        jnp.full_like(x, _SH_C0),
        -0.48860251190291987 * y,
        0.48860251190291987 * z,
        -0.48860251190291987 * x,
        1.0925484305920792 * xy,
        -1.0925484305920792 * yz,
        0.94617469575755997 * z2 - 0.31539156525251999,
        -1.0925484305920792 * xz,
        0.54627421529603959 * x2 - 0.54627421529603959 * y2,
        0.59004358992664352 * y * (-3.0 * x2 + y2),
        2.8906114426405538 * xy * z,
        0.45704579946446572 * y * (1.0 - 5.0 * z2),
        0.3731763325901154 * z * (5.0 * z2 - 3.0),
        0.45704579946446572 * x * (1.0 - 5.0 * z2),
        1.4453057213202769 * z * (x2 - y2),
        0.59004358992664352 * x * (-x2 + 3.0 * y2),
    ], axis=-1)
    feat = jnp.concatenate([d_feat, sh], axis=-1)
    logits = jnp.einsum("vrk,ok->vro", feat, params["ws"]) + params["bs"]
    return jax.nn.sigmoid(logits)


# ----------------------------------------------------------------------------
if __name__ == "__main__":
    # Small synthetic config consistent with the module:
    #   descriptor_dim (hidden) = 32, z_length_s * hash_n_levels (input) = 4*8.
    # Nv*Nr = 128 rows == exactly one full 128-lane tile.
    Nv, Nr = 2, 64
    hidden_dim = 32
    input_dim = 4 * 8          # z_length_s * hash_n_levels

    key = jax.random.PRNGKey(0)
    kp, k1, k2, k3, k4, k5 = jax.random.split(key, 6)

    params = init_cnet_params(kp, input_dim, hidden_dim)

    # Forward inputs (l_emb, x_emb, n are unused by CNet.forward but provided).
    l_emb = jax.random.normal(k1, (Nv, Nr, 8), jnp.float32)
    x_emb = jax.random.normal(k2, (Nv, Nr, 8), jnp.float32)
    s_feat = jax.random.normal(k3, (Nv, Nr, input_dim), jnp.float32)
    n = jax.random.normal(k4, (Nv, Nr, 3), jnp.float32)
    v_raw = jax.random.normal(k5, (Nv, Nr, 3), jnp.float32)
    v = v_raw / jnp.linalg.norm(v_raw, axis=-1, keepdims=True)   # unit dirs

    c, z0, z1 = cnet_forward(params, l_emb, x_emb, s_feat, n, v)
    jax.block_until_ready((c, z0, z1))

    assert c.shape == (Nv, Nr, 3)
    assert z0.shape == c.shape and z1.shape == c.shape
    assert bool(jnp.all(jnp.isfinite(c)))
    assert bool(jnp.all((c >= 0.0) & (c <= 1.0)))   # sigmoid output range

    # Numerical check vs full-precision reference (kernel path runs s_feat, v,
    # the folded weights and the output in bf16; everything else in f32).
    c_ref = cnet_reference(params, s_feat, v)
    err = float(jnp.max(jnp.abs(c - c_ref)))
    assert err < 5e-2, f"max abs err {err}"

    print("KERNEL_OK")
</pallas_src>

<mosaic_0001>
module attributes {stable_mosaic.version = 11 : i64} {
  func.func @_cnet_kernel(%arg0: i32, %arg1: memref<35x128xbf16, #tpu.memory_space<vmem>>, %arg2: memref<3x35xbf16, #tpu.memory_space<vmem>>, %arg3: memref<3x12xf32, #tpu.memory_space<vmem>>, %arg4: memref<3x1xf32, #tpu.memory_space<vmem>>, %arg5: memref<3x128xbf16, #tpu.memory_space<vmem>>) attributes {dimension_semantics = [#tpu.dimension_semantics<parallel>], iteration_bounds = array<i64: 1>, scalar_prefetch = 0 : i64, scratch_operands = 0 : i64, tpu.core_type = #tpu.core_type<tc>, window_params = [{transform_indices = @transform_0, window_bounds = array<i64: 35, 128>}, {pipeline_mode = #tpu.pipeline_mode<synchronous>, transform_indices = @transform_1, window_bounds = array<i64: 3, 35>}, {pipeline_mode = #tpu.pipeline_mode<synchronous>, transform_indices = @transform_2, window_bounds = array<i64: 3, 12>}, {pipeline_mode = #tpu.pipeline_mode<synchronous>, transform_indices = @transform_3, window_bounds = array<i64: 3, 1>}, {transform_indices = @transform_4, window_bounds = array<i64: 3, 128>}]} {
    %c0 = arith.constant 0 : index
    %c0_0 = arith.constant 0 : index
    %0 = vector.load %arg1[%c0, %c0_0] : memref<35x128xbf16, #tpu.memory_space<vmem>>, vector<35x128xbf16>
    %c0_1 = arith.constant 0 : index
    %c0_2 = arith.constant 0 : index
    %1 = vector.load %arg2[%c0_1, %c0_2] : memref<3x35xbf16, #tpu.memory_space<vmem>>, vector<3x35xbf16>
    %cst = arith.constant dense<0.000000e+00> : vector<3x128xf32>
    %2 = tpu.matmul %1, %0, %cst {dimension_numbers = #tpu.dot_dimension_numbers<[1], [0], [0], [1], [0, 0, 1, 1], [], []>} : vector<3x35xbf16>, vector<35x128xbf16>, vector<3x128xf32> -> vector<3x128xf32>
    %c0_3 = arith.constant 0 : index
    %c0_4 = arith.constant 0 : index
    %3 = vector.load %arg4[%c0_3, %c0_4] : memref<3x1xf32, #tpu.memory_space<vmem>>, vector<3x1xf32>
    %4 = vector.broadcast %3 : vector<3x1xf32> to vector<3x128xf32>
    %5 = arith.addf %2, %4 : vector<3x128xf32>
    %6 = vector.extract_strided_slice %0 {offsets = [0, 0], sizes = [3, 128], strides = [1, 1]} : vector<35x128xbf16> to vector<3x128xbf16>
    %7 = arith.extf %6 : vector<3x128xbf16> to vector<3x128xf32>
    %8 = vector.extract_strided_slice %7 {offsets = [0, 0], sizes = [1, 128], strides = [1, 1]} : vector<3x128xf32> to vector<1x128xf32>
    %9 = vector.extract_strided_slice %7 {offsets = [1, 0], sizes = [1, 128], strides = [1, 1]} : vector<3x128xf32> to vector<1x128xf32>
    %10 = vector.extract_strided_slice %7 {offsets = [2, 0], sizes = [1, 128], strides = [1, 1]} : vector<3x128xf32> to vector<1x128xf32>
    %11 = arith.mulf %7, %7 : vector<3x128xf32>
    %12 = vector.extract_strided_slice %11 {offsets = [0, 0], sizes = [1, 128], strides = [1, 1]} : vector<3x128xf32> to vector<1x128xf32>
    %13 = vector.extract_strided_slice %11 {offsets = [1, 0], sizes = [1, 128], strides = [1, 1]} : vector<3x128xf32> to vector<1x128xf32>
    %14 = vector.extract_strided_slice %11 {offsets = [2, 0], sizes = [1, 128], strides = [1, 1]} : vector<3x128xf32> to vector<1x128xf32>
    %15 = arith.mulf %8, %9 : vector<1x128xf32>
    %16 = arith.mulf %9, %10 : vector<1x128xf32>
    %17 = arith.mulf %8, %10 : vector<1x128xf32>
    %18 = arith.subf %12, %13 : vector<1x128xf32>
    %cst_5 = arith.constant 5.000000e+00 : f32
    %19 = vector.broadcast %cst_5 : f32 to vector<1x128xf32>
    %20 = arith.mulf %19, %14 : vector<1x128xf32>
    %cst_6 = arith.constant 1.000000e+00 : f32
    %21 = vector.broadcast %cst_6 : f32 to vector<1x128xf32>
    %22 = arith.subf %21, %20 : vector<1x128xf32>
    %cst_7 = arith.constant 3.000000e+00 : f32
    %23 = vector.broadcast %cst_7 : f32 to vector<1x128xf32>
    %24 = arith.mulf %23, %12 : vector<1x128xf32>
    %25 = arith.subf %13, %24 : vector<1x128xf32>
    %26 = arith.mulf %9, %25 : vector<1x128xf32>
    %27 = arith.mulf %15, %10 : vector<1x128xf32>
    %28 = arith.mulf %9, %22 : vector<1x128xf32>
    %cst_8 = arith.constant 3.000000e+00 : f32
    %29 = vector.broadcast %cst_8 : f32 to vector<1x128xf32>
    %30 = arith.subf %20, %29 : vector<1x128xf32>
    %31 = arith.mulf %10, %30 : vector<1x128xf32>
    %32 = arith.mulf %8, %22 : vector<1x128xf32>
    %33 = arith.mulf %10, %18 : vector<1x128xf32>
    %cst_9 = arith.constant 3.000000e+00 : f32
    %34 = vector.broadcast %cst_9 : f32 to vector<1x128xf32>
    %35 = arith.mulf %34, %13 : vector<1x128xf32>
    %36 = arith.subf %35, %12 : vector<1x128xf32>
    %37 = arith.mulf %8, %36 : vector<1x128xf32>
    %c0_10 = arith.constant 0 : index
    %c0_11 = arith.constant 0 : index
    %38 = vector.load %arg3[%c0_10, %c0_11] : memref<3x12xf32, #tpu.memory_space<vmem>>, vector<3x12xf32>
    %39 = vector.extract_strided_slice %38 {offsets = [0, 0], sizes = [3, 1], strides = [1, 1]} : vector<3x12xf32> to vector<3x1xf32>
    %40 = vector.broadcast %39 : vector<3x1xf32> to vector<3x128xf32>
    %41 = vector.broadcast %15 : vector<1x128xf32> to vector<3x128xf32>
    %42 = arith.mulf %40, %41 : vector<3x128xf32>
    %43 = arith.addf %5, %42 : vector<3x128xf32>
    %44 = vector.extract_strided_slice %38 {offsets = [0, 1], sizes = [3, 1], strides = [1, 1]} : vector<3x12xf32> to vector<3x1xf32>
    %45 = vector.broadcast %44 : vector<3x1xf32> to vector<3x128xf32>
    %46 = vector.broadcast %16 : vector<1x128xf32> to vector<3x128xf32>
    %47 = arith.mulf %45, %46 : vector<3x128xf32>
    %48 = arith.addf %43, %47 : vector<3x128xf32>
    %49 = vector.extract_strided_slice %38 {offsets = [0, 2], sizes = [3, 1], strides = [1, 1]} : vector<3x12xf32> to vector<3x1xf32>
    %50 = vector.broadcast %49 : vector<3x1xf32> to vector<3x128xf32>
    %51 = vector.broadcast %14 : vector<1x128xf32> to vector<3x128xf32>
    %52 = arith.mulf %50, %51 : vector<3x128xf32>
    %53 = arith.addf %48, %52 : vector<3x128xf32>
    %54 = vector.extract_strided_slice %38 {offsets = [0, 3], sizes = [3, 1], strides = [1, 1]} : vector<3x12xf32> to vector<3x1xf32>
    %55 = vector.broadcast %54 : vector<3x1xf32> to vector<3x128xf32>
    %56 = vector.broadcast %17 : vector<1x128xf32> to vector<3x128xf32>
    %57 = arith.mulf %55, %56 : vector<3x128xf32>
    %58 = arith.addf %53, %57 : vector<3x128xf32>
    %59 = vector.extract_strided_slice %38 {offsets = [0, 4], sizes = [3, 1], strides = [1, 1]} : vector<3x12xf32> to vector<3x1xf32>
    %60 = vector.broadcast %59 : vector<3x1xf32> to vector<3x128xf32>
    %61 = vector.broadcast %18 : vector<1x128xf32> to vector<3x128xf32>
    %62 = arith.mulf %60, %61 : vector<3x128xf32>
    %63 = arith.addf %58, %62 : vector<3x128xf32>
    %64 = vector.extract_strided_slice %38 {offsets = [0, 5], sizes = [3, 1], strides = [1, 1]} : vector<3x12xf32> to vector<3x1xf32>
    %65 = vector.broadcast %64 : vector<3x1xf32> to vector<3x128xf32>
    %66 = vector.broadcast %26 : vector<1x128xf32> to vector<3x128xf32>
    %67 = arith.mulf %65, %66 : vector<3x128xf32>
    %68 = arith.addf %63, %67 : vector<3x128xf32>
    %69 = vector.extract_strided_slice %38 {offsets = [0, 6], sizes = [3, 1], strides = [1, 1]} : vector<3x12xf32> to vector<3x1xf32>
    %70 = vector.broadcast %69 : vector<3x1xf32> to vector<3x128xf32>
    %71 = vector.broadcast %27 : vector<1x128xf32> to vector<3x128xf32>
    %72 = arith.mulf %70, %71 : vector<3x128xf32>
    %73 = arith.addf %68, %72 : vector<3x128xf32>
    %74 = vector.extract_strided_slice %38 {offsets = [0, 7], sizes = [3, 1], strides = [1, 1]} : vector<3x12xf32> to vector<3x1xf32>
    %75 = vector.broadcast %74 : vector<3x1xf32> to vector<3x128xf32>
    %76 = vector.broadcast %28 : vector<1x128xf32> to vector<3x128xf32>
    %77 = arith.mulf %75, %76 : vector<3x128xf32>
    %78 = arith.addf %73, %77 : vector<3x128xf32>
    %79 = vector.extract_strided_slice %38 {offsets = [0, 8], sizes = [3, 1], strides = [1, 1]} : vector<3x12xf32> to vector<3x1xf32>
    %80 = vector.broadcast %79 : vector<3x1xf32> to vector<3x128xf32>
    %81 = vector.broadcast %31 : vector<1x128xf32> to vector<3x128xf32>
    %82 = arith.mulf %80, %81 : vector<3x128xf32>
    %83 = arith.addf %78, %82 : vector<3x128xf32>
    %84 = vector.extract_strided_slice %38 {offsets = [0, 9], sizes = [3, 1], strides = [1, 1]} : vector<3x12xf32> to vector<3x1xf32>
    %85 = vector.broadcast %84 : vector<3x1xf32> to vector<3x128xf32>
    %86 = vector.broadcast %32 : vector<1x128xf32> to vector<3x128xf32>
    %87 = arith.mulf %85, %86 : vector<3x128xf32>
    %88 = arith.addf %83, %87 : vector<3x128xf32>
    %89 = vector.extract_strided_slice %38 {offsets = [0, 10], sizes = [3, 1], strides = [1, 1]} : vector<3x12xf32> to vector<3x1xf32>
    %90 = vector.broadcast %89 : vector<3x1xf32> to vector<3x128xf32>
    %91 = vector.broadcast %33 : vector<1x128xf32> to vector<3x128xf32>
    %92 = arith.mulf %90, %91 : vector<3x128xf32>
    %93 = arith.addf %88, %92 : vector<3x128xf32>
    %94 = vector.extract_strided_slice %38 {offsets = [0, 11], sizes = [3, 1], strides = [1, 1]} : vector<3x12xf32> to vector<3x1xf32>
    %95 = vector.broadcast %94 : vector<3x1xf32> to vector<3x128xf32>
    %96 = vector.broadcast %37 : vector<1x128xf32> to vector<3x128xf32>
    %97 = arith.mulf %95, %96 : vector<3x128xf32>
    %98 = arith.addf %93, %97 : vector<3x128xf32>
    %99 = arith.negf %98 : vector<3x128xf32>
    %100 = math.exp %99 : vector<3x128xf32>
    %cst_12 = arith.constant 1.000000e+00 : f32
    %101 = vector.broadcast %cst_12 : f32 to vector<3x128xf32>
    %102 = arith.addf %101, %100 : vector<3x128xf32>
    %103 = arith.divf %101, %102 : vector<3x128xf32>
    %104 = arith.truncf %103 : vector<3x128xf32> to vector<3x128xbf16>
    %c0_13 = arith.constant 0 : index
    %c0_14 = arith.constant 0 : index
    %105 = vector.load %arg5[%c0_13, %c0_14] : memref<3x128xbf16, #tpu.memory_space<vmem>>, vector<3x128xbf16>
    tpu.vector_store %arg5[%c0_13, %c0_14], %104 {strides = array<i32>} : memref<3x128xbf16, #tpu.memory_space<vmem>>, vector<3x128xbf16>,
    return
  }
  func.func @transform_0(%arg0: i32) -> (i32, i32) {
    %c0_i32 = arith.constant 0 : i32
    %c0_i32_0 = arith.constant 0 : i32
    return %c0_i32, %arg0 : i32, i32
  }
  func.func @transform_1(%arg0: i32) -> (i32, i32) {
    %c0_i32 = arith.constant 0 : i32
    %c0_i32_0 = arith.constant 0 : i32
    %c0_i32_1 = arith.constant 0 : i32
    return %c0_i32, %c0_i32_0 : i32, i32
  }
  func.func @transform_2(%arg0: i32) -> (i32, i32) {
    %c0_i32 = arith.constant 0 : i32
    %c0_i32_0 = arith.constant 0 : i32
    %c0_i32_1 = arith.constant 0 : i32
    return %c0_i32, %c0_i32_0 : i32, i32
  }
  func.func @transform_3(%arg0: i32) -> (i32, i32) {
    %c0_i32 = arith.constant 0 : i32
    %c0_i32_0 = arith.constant 0 : i32
    %c0_i32_1 = arith.constant 0 : i32
    return %c0_i32, %c0_i32_0 : i32, i32
  }
  func.func @transform_4(%arg0: i32) -> (i32, i32) {
    %c0_i32 = arith.constant 0 : i32
    %c0_i32_0 = arith.constant 0 : i32
    return %c0_i32, %arg0 : i32, i32
  }
}

</mosaic_0001>

<bundles_post_ra>
// kernel: cnet_forward.1
= control target key start
LH: loop header
LB: loop body
LE: loop exit
PB: predicated region body
PF: predicated region fallthrough
CT: control target
= control target key end

     0   :  { %vm49_vm0 = vcmask 1040384   ;;  %vm50_vm1 = vcmask 1041408   ;;  %v270_v1 = vmov 65535   ;;  %v271_v4 = vmov 0   ;;  %s337_s0 = inlined_call_operand.vmem [shape: bf16[35,128], index: 0, kind: input, shape index: {}]   ;;  %s338_s3 = inlined_call_operand.vmem [shape: f32[3,1], index: 3, kind: input, shape index: {}]   ;;  %s339_s2 = inlined_call_operand.vmem [shape: f32[3,12], index: 2, kind: input, shape index: {}]   ;;  %s340_s1 = inlined_call_operand.vmem [shape: bf16[3,35], index: 1, kind: input, shape index: {}]   ;;  %s341_s4 = inlined_call_operand.vmem [shape: bf16[3,128], index: 4, kind: output, shape index: {}]  }
   0x1   :  { %v22_v0 = vld [vmem:[%s337_s0 + $0x10] sm:$0x3]  ;;  %v51_v2 = vsel %vm49_vm0, 4294967295, %v270_v1  ;;  %253 = vset.pattern.permute.xlu0 %v271_v4  ;;  %v24_v5 = vld [vmem:[%s338_s3] sm:$0x7]  ;;  %v272_v7 = vmov 1  }
   0x2   :  { %v39_v3 = vunpack.c.l.b16 %v22_v0  ;;  %v52_v6 = vsel %vm50_vm1, %v51_v2, 0  ;;  %27 = vperm.xlu0 %253, %v24_v5   ;;  %254 = vset.pattern.permute.xlu1 %v272_v7  ;;  %v111_v8 = vld [vmem:[%s339_s2] sm:$0x7]  ;;  %v273_v11 = vmov 3   ;;  %v239_v12 = vld [vmem:[%s337_s0 + $0x8] sm:$0xff]  ;;  %v274_v14 = vmov 2  }
   0x3   :  { %121 = vperm.xlu1 %254, %v111_v8   ;;  %256 = vset.pattern.permute.xlu2 %v273_v11  ;;  %v238_v13 = vld [vmem:[%s337_s0] sm:$0xff]  ;;  %v275_v15 = vmov 4   ;;  %vm45_vm2 = vcmask 285696   ;;  %v276_v17 = vmov 5   ;;  %v277_v18 = vmov 6  }
   0x4   :  { %v42_v9 = vpack.c.b16 %v39_v3, %v39_v3  ;;  %135 = vperm.xlu2 %256, %v111_v8   ;;  %v23_v16 = vld [vmem:[%s340_s1] sm:$0x3]  ;;  %v278_v19 = vmov 7   ;;  %v279_v20 = vmov 10   ;;  %v280_v21 = vmov 8  }
   0x5   :  { %v281_v22 = vmov 9   ;;  %v282_v23 = vmov 11   ;;  %v18_v25 = vld [vmem:[%s337_s0] sm:$0xf]  ;;  %vm218_vm4 = vsmask.f32 1280 }
   0x6   :  { %v54_v10 = vand.u32 %v52_v6, %v42_v9  ;;  %v69_v26 = vunpack.c.l.bf16 %v18_v25  ;;  %vm219_vm8 = vmand %vm50_vm1, %vm218_vm4 }
   0x8   :  { %61 = vmatpush.bf16.msra.mxu0 %v54_v10  ;;  %v70_v28 = vmul.f32 %v69_v26, %v69_v26  ;;  %v72_v32 = vrot.slane %v69_v26, 1  ;;  %v75_v36 = vrot.slane %v69_v26, 2 }
   0xa   :  { %114 = vperm.xlu0 %253, %v111_v8   ;;  %v84_v31 = vmul.f32 3.0, %v70_v28  ;;  %v74_v35 = vmul.f32 %v72_v32, %v69_v26  ;;  %v82_v37 = vmul.f32 5.0, %v70_v28  ;;  %v79_v38 = vrot.slane %v70_v28, 1 }
   0xb   :  { %255 = vset.pattern.permute.xlu1 %v274_v14  ;;  %v77_v44 = vmul.f32 %v75_v36, %v69_v26  ;;  %v131_v50 = vperm.slane %v70_v28, 2  ;;  %v104_v52 = vrot.slane %v70_v28, 7 }
   0xc   :  { %62 = vmatpush.bf16.msra.mxu0 %v239_v12  ;;  %128 = vperm.xlu1 %255, %v111_v8   ;;  %v86_v33 = vrot.slane %v84_v31, 7  ;;  %v117_v40 = vperm.slane %v74_v35, 0  ;;  %v124_v43 = vperm.slane %v74_v35, 1  ;;  %v83_v45 = vsub.f32 1.0, %v82_v37 }
   0xd   :  { %257 = vset.pattern.permute.xlu2 %v275_v15  ;;  %v81_v46 = vsub.f32 %v70_v28, %v79_v38  ;;  %v138_v54 = vperm.slane %v77_v44, 0  ;;  %v90_v58 = vmul.f32 %v75_v36, %v74_v35  ;;  %v236_v61 = vadd.f32 -3.0, %v82_v37 }
   0xe   :  { %142 = vperm.xlu2 %257, %v111_v8   ;;  %v88_v39 = vsub.f32 %v70_v28, %v86_v33  ;;  %v92_v56 = vrot.slane %v83_v45, 1  ;;  %v97_v0 = vrot.slane %v83_v45, 2  ;;  %v106_v1 = vsub.f32 %v84_v31, %v104_v52  ;;  %v220_v52 = vld [vmem:[%s341_s4] sm:$0x3] }
   0xf   :  { %v145_v57 = vperm.slane %v81_v46, 0  ;;  %v101_v6 = vrot.slane %v81_v46, 6  ;;  %v96_v11 = vmul.f32 %v236_v61, %v69_v26 }
  0x10   :  { %63 = vmatpush.bf16.msra.mxu0 %v238_v13  ;;  %v89_v48 = vmul.f32 %v88_v39, %v69_v26  ;;  %v94_v5 = vmul.f32 %v92_v56, %v69_v26  ;;  %v99_v14 = vmul.f32 %v97_v0, %v69_v26  ;;  %v108_v15 = vrot.slane %v106_v1, 1 }
  0x12   :  { %258 = vset.pattern.permute.xlu0 %v276_v17  ;;  %v152_v60 = vperm.slane %v89_v48, 1 }
  0x13   :  { %235 = vmatmul.msk.bf16.vlgmr.msra.gmra.mxu0 %vm45_vm2, %v23_v16  ;;  %149 = vperm.xlu0 %258, %v111_v8   ;;  %v166_v16 = vperm.slane %v94_v5, 1 }
  0x14   :  { %259 = vset.pattern.permute.xlu1 %v277_v18  ;;  %v103_v18 = vmul.f32 %v101_v6, %v69_v26 }
  0x15   :  { %156 = vperm.xlu1 %259, %v111_v8  }
  0x16   :  { %260 = vset.pattern.permute.xlu2 %v278_v19  ;;  %v173_v19 = vperm.slane %v96_v11, 2  ;;  %v187_v28 = vperm.slane %v103_v18, 2 }
  0x17   :  { %163 = vperm.xlu2 %260, %v111_v8  }
  0x1b   :  { %263 = vset.pattern.permute.xlu0 %v279_v20 }
  0x1c   :  { %184 = vperm.xlu0 %263, %v111_v8  }
  0x1d   :  { %261 = vset.pattern.permute.xlu1 %v280_v21 }
  0x1e   :  { %170 = vperm.xlu1 %261, %v111_v8  }
  0x1f   :  { %262 = vset.pattern.permute.xlu2 %v281_v22  ;;  %v180_v22 = vperm.slane %v99_v14, 0 }
  0x20   :  { %177 = vperm.xlu2 %262, %v111_v8  }
  0x24   :  { %265 = vset.pattern.permute.xlu0 %v282_v23 }
  0x26   :  { %264 = vset.pattern.permute.xlu1 %v282_v23  ;;  %v110_v23 = vmul.f32 %v108_v15, %v69_v26 }
  0x27   :  { %191 = vperm.xlu1 %264, %v111_v8   ;;  %v159_v8 = vperm.slane %v90_v58, 0 }
  0x28   :  { %v194_v33 = vperm.slane %v110_v23, 0 }
  0x5e   :  { %v136_v27 = vpop.permute.xlu2 %135 }
  0x5f   :  { %v139_v3 = vmul.f32 %v138_v54, %v136_v27 }
  0x68   :  { %v143_v34 = vpop.permute.xlu2 %142 }
  0x69   :  { %v146_v7 = vmul.f32 %v145_v57, %v143_v34 }
  0x71   :  { %v164_v59 = vpop.permute.xlu2 %163 }
  0x72   :  { %v167_v25 = vmul.f32 %v166_v16, %v164_v59 }
  0x74   :  { %v28_v29 = vpop.permute.xlu0 %27 }
  0x75   :  { %v122_v24 = vpop.permute.xlu1 %121 }
  0x76   :  { %v125_v53 = vmul.f32 %v124_v43, %v122_v24 }
  0x7a   :  { %v178_v24 = vpop.permute.xlu2 %177 }
  0x7b   :  { %v181_v32 = vmul.f32 %v180_v22, %v178_v24 }
  0x7c   :  { %v115_v41 = vpop.permute.xlu0 %114 }
  0x7d   :  { %v118_v49 = vmul.f32 %v117_v40, %v115_v41 }
  0x7e   :  { %v129_v30 = vpop.permute.xlu1 %128 }
  0x7f   :  { %v132_v62 = vmul.f32 %v131_v50, %v129_v30 }
  0x85   :  { %v150_v2 = vpop.permute.xlu0 %149 }
  0x86   :  { %v153_v13 = vmul.f32 %v152_v60, %v150_v2 }
  0x87   :  { %v157_v42 = vpop.permute.xlu1 %156 }
  0x88   :  { %v160_v20 = vmul.f32 %v159_v8, %v157_v42 }
  0x90   :  { %v65_v47 = vpop.f32.mrf.mxu0  ;;  %v171_v10 = vpop.permute.xlu1 %170 }
  0x91   :  { %v66_v51 = vadd.f32 %v65_v47, %v28_v29  ;;  %v185_v29 = vpop.permute.xlu0 %184  ;;  %v174_v31 = vmul.f32 %v173_v19, %v171_v10 }
  0x92   :  { %v188_v36 = vmul.f32 %v187_v28, %v185_v29 }
  0x93   :  { %v119_v55 = vadd.f32 %v118_v49, %v66_v51 }
  0x95   :  { %v126_v63 = vadd.f32 %v125_v53, %v119_v55 }
  0x97   :  { %v133_v4 = vadd.f32 %v132_v62, %v126_v63 }
  0x98   :  { %v67_v9 = vpop.f32.mrf.mxu0 }
  0x99   :  { %v140_v12 = vadd.f32 %v139_v3, %v133_v4  ;;  %v192_v34 = vpop.permute.xlu1 %191 }
  0x9a   :  { %v195_v38 = vmul.f32 %v194_v33, %v192_v34 }
  0x9b   :  { %v147_v17 = vadd.f32 %v146_v7, %v140_v12 }
  0x9d   :  { %v154_v21 = vadd.f32 %v153_v13, %v147_v17 }
  0x9f   :  { %v161_v27 = vadd.f32 %v160_v20, %v154_v21 }
  0xa1   :  { %v168_v30 = vadd.f32 %v167_v25, %v161_v27 }
  0xa3   :  { %v175_v35 = vadd.f32 %v174_v31, %v168_v30 }
  0xa5   :  { %v182_v37 = vadd.f32 %v181_v32, %v175_v35 }
  0xa7   :  { %v189_v39 = vadd.f32 %v188_v36, %v182_v37 }
  0xa9   :  { %v196_v40 = vadd.f32 %v195_v38, %v189_v39 }
  0xab   :  { %v237_v41 = vmul.f32 -1.442695, %v196_v40 }
  0xad   :  { %266 = vpow2.f32 %v237_v41 }
  0xb3   :  { %v267_v42 = vpop.eup %266 }
  0xb4   :  { %v200_v26 = vadd.f32 1.0, %v267_v42 }
  0xb6   :  { %268 = vrcp.f32 %v200_v26  ;;  %v212_v46 = vand.u32 2147483648, %v200_v26  ;;  %v210_v48 = vand.u32 2147483647, %v200_v26  ;;  %vm206_vm5 = vweird.f32 %v200_v26 }
  0xb8   :  { %v213_v50 = vor.u32 1.1754944e-38, %v212_v46  ;;  %vm211_vm7 = vcmp.eq.f32.partialorder %v210_v48, 8.507059e+37 }
  0xbc   :  { %v269_v43 = vpop.eup %268 }
  0xbd   :  { %v202_v44 = vmul.f32 %v269_v43, %v200_v26  ;;  %vm207_vm3 = vweird.f32 %v269_v43 }
  0xbe   :  { %vm208_vm6 = vmor %vm206_vm5, %vm207_vm3 }
  0xbf   :  { %v203_v45 = vsub.f32 1.0, %v202_v44 }
  0xc1   :  { %v204_v47 = vmul.f32 %v269_v43, %v203_v45 }
  0xc3   :  { %v205_v49 = vadd.f32 %v269_v43, %v204_v47 }
  0xc5   :  { %v209_v51 = vsel %vm208_vm6, %v269_v43, %v205_v49 }
  0xc6   :  { %v214_v53 = vsel %vm211_vm7, %v213_v50, %v209_v51 }
  0xc7   :  { %v216_v54 = vpack.c.bf16 %v214_v53, %v214_v53 }
  0xc9   :  { %v221_v55 = vsel %vm219_vm8, %v216_v54, %v220_v52 }
  0xca   :  { %222 = vst [vmem:[%s341_s4] sm:$0x3] %v221_v55 }

</bundles_post_ra>
